<compile_context>
chip_gen: v5e
topology: v5e:2x2
jax: 0.10.0
libtpu: 0.0.40
codegen_flags: <defaults>
</compile_context>

<pallas_src>
import functools

import jax
import jax.numpy as jnp
from jax.experimental import pallas as pl
from jax.experimental.pallas import tpu as pltpu


def _round_up(x, m):
    return (x + m - 1) // m * m


def _cdiv(a, b):
    return (a + b - 1) // b


def _pick_tile(dim, prefer):
    for t in (prefer, 512, 256, 128):
        if t <= dim and dim % t == 0:
            return t
    return 128  # dim is always a multiple of 128 when this is reached


def residual_linear_kernel(x_ref, w_ref, b_ref, o_ref, acc_ref):
    """One (i, j, k) grid step of out = x @ w + b + x.

    x_ref  : (tm, tk) activation tile, block (i, (j + k + 1) % Kt)
    w_ref  : (tk, tn) weight tile,     block ((j + k + 1) % Kt, j)
    b_ref  : (1,  tn) f32 bias tile,   block (0, j)
    o_ref  : (tm, tn) output tile,     block (i, j)
    acc_ref: (tm, tn) f32 accumulator scratch, resident across the k axis.

    The rotated K visit order makes the x tile at the LAST k step equal to
    column block j, i.e. exactly the residual tile, so it is reused in the
    epilogue and no separate residual input stream is needed.
    """
    k = pl.program_id(2)

    @pl.when(k == 0)
    def _():
        # Fold the bias into the accumulator init (saves a zero-fill + add).
        acc_ref[...] = jnp.broadcast_to(b_ref[...], acc_ref.shape)

    acc_ref[...] += jnp.dot(
        x_ref[...], w_ref[...], preferred_element_type=jnp.float32
    )

    @pl.when(k == pl.num_programs(2) - 1)
    def _():
        # x_ref now holds column block j -> it IS the residual tile.
        o_ref[...] = (
            acc_ref[...] + x_ref[...].astype(jnp.float32)
        ).astype(o_ref.dtype)


@functools.partial(jax.jit, static_argnames=("tm", "resident_budget_bytes"))
def residual_forward(x, w, b, *, tm=512,
                     resident_budget_bytes=40 * 1024 * 1024):
    """Residual(Linear)(x) = x @ w + b + x.

    x: [B, S, H]; w: [H, H] (pre-transposed so y = x @ w); b: [H].
    Pass bf16 x/w for full-rate MXU; accumulation is always f32.
    """
    B, S, H = x.shape
    M = B * S
    out_dtype = x.dtype
    in_itemsize = jnp.dtype(x.dtype).itemsize
    out_itemsize = jnp.dtype(out_dtype).itemsize

    # Pad H only when it is genuinely not a multiple of 128 (lane density).
    Hp = H if H % 128 == 0 else _round_up(H, 128)
    row_mult = 16 if x.dtype == jnp.bfloat16 else 8

    # Base row tile (never larger than the row extent).
    tm = max(row_mult, min(tm, _round_up(M, row_mult)))
    tm = _round_up(tm, row_mult)

    def vmem_est(tm_, tn_, tk_):
        return (2 * tm_ * tk_ * in_itemsize        # x   (double-buffered)
                + 2 * tk_ * tn_ * in_itemsize      # w   (double-buffered)
                + 2 * tn_ * 4                      # bias (f32)
                + 2 * tm_ * tn_ * out_itemsize     # out (double-buffered)
                + tm_ * tn_ * 4)                   # f32 accumulator scratch

    # Resident-weight path: W is DMA'd exactly once when it fits the budget.
    if vmem_est(tm, Hp, Hp) <= resident_budget_bytes:
        tn = tk = Hp
    else:
        t = _pick_tile(Hp, 512)
        while t > 128 and vmem_est(tm, t, t) > resident_budget_bytes:
            t //= 2
        tn = tk = t                                # tn == tk (rotation needs it)
        while vmem_est(tm, tn, tk) > resident_budget_bytes and tm > row_mult:
            tm = _round_up(max(tm // 2, row_mult), row_mult)

    # Megacore (v7x): ensure the parallel row axis has >= 2 iterations.
    if _cdiv(M, tm) == 1 and M >= 2 * row_mult:
        tm = _round_up(_cdiv(M, 2), row_mult)

    # --- Wrapper-side layout (no M padding; H padded only if needed) -------
    x2d = x.reshape(M, H)
    if Hp != H:
        x2d = jnp.pad(x2d, ((0, 0), (0, Hp - H)))
        w_p = jnp.pad(w, ((0, Hp - H), (0, Hp - H)))
        b_p = jnp.pad(b, (0, Hp - H))
    else:
        w_p = w
        b_p = b
    b_p = b_p.astype(jnp.float32).reshape(1, Hp)   # pre-cast bias to f32

    Kt = Hp // tk
    grid = (_cdiv(M, tm), Hp // tn, Kt)

    vmem_limit = int(min(max(vmem_est(tm, tn, tk) * 3 // 2,
                             32 * 1024 * 1024),
                         48 * 1024 * 1024))

    def x_map(i, j, k):
        return (i, (j + k + 1) % Kt)

    def w_map(i, j, k):
        return ((j + k + 1) % Kt, j)

    out_p = pl.pallas_call(
        residual_linear_kernel,
        out_shape=jax.ShapeDtypeStruct((M, Hp), out_dtype),
        grid_spec=pltpu.PrefetchScalarGridSpec(
            num_scalar_prefetch=0,
            grid=grid,
            in_specs=[
                pl.BlockSpec((tm, tk), x_map),                 # x (matmul + residual)
                pl.BlockSpec((tk, tn), w_map),                 # w
                pl.BlockSpec((1, tn), lambda i, j, k: (0, j)),  # bias (f32)
            ],
            out_specs=pl.BlockSpec((tm, tn), lambda i, j, k: (i, j)),
            scratch_shapes=[pltpu.VMEM((tm, tn), jnp.float32)],
        ),
        compiler_params=pltpu.CompilerParams(
            dimension_semantics=("parallel", "parallel", "arbitrary"),
            vmem_limit_bytes=vmem_limit,
        ),
    )(x2d, w_p, b_p)

    out = out_p[:, :H] if Hp != H else out_p
    return out.reshape(B, S, H)


if __name__ == "__main__":
    # --- Test 1: f32, tiny shapes (H=32 not a multiple of 128 -> padded H) --
    B, S, H = 2, 8, 32
    kx, kw, kb = jax.random.split(jax.random.PRNGKey(0), 3)
    x = jax.random.normal(kx, (B, S, H), dtype=jnp.float32)
    # PyTorch Linear computes x @ W.T + b; pre-transpose so the kernel does x @ w.
    w_torch = jax.random.normal(kw, (H, H), dtype=jnp.float32) / (H ** 0.5)
    w = w_torch.T
    b = jax.random.normal(kb, (H,), dtype=jnp.float32) * 0.01

    out = jax.block_until_ready(residual_forward(x, w, b))
    ref = (x.reshape(B * S, H) @ w + b + x.reshape(B * S, H)).reshape(B, S, H)
    assert jnp.allclose(out, ref, atol=1e-3, rtol=1e-3), "f32 mismatch vs reference"

    # --- Test 2: bf16, H % 128 == 0 -> no padding, resident-weight path -----
    B2, S2, H2 = 2, 200, 384   # M = 400 -> 2 row tiles; W (384x384) resident
    k2x, k2w, k2b = jax.random.split(jax.random.PRNGKey(1), 3)
    x2 = jax.random.normal(k2x, (B2, S2, H2), dtype=jnp.bfloat16)
    w2 = (jax.random.normal(k2w, (H2, H2), dtype=jnp.float32) / (H2 ** 0.5)
          ).astype(jnp.bfloat16)
    b2 = (jax.random.normal(k2b, (H2,), dtype=jnp.float32) * 0.01
          ).astype(jnp.bfloat16)

    ref2 = (
        x2.reshape(-1, H2).astype(jnp.float32) @ w2.astype(jnp.float32)
        + b2.astype(jnp.float32)
        + x2.reshape(-1, H2).astype(jnp.float32)
    ).reshape(B2, S2, H2)

    out2 = jax.block_until_ready(residual_forward(x2, w2, b2))
    assert jnp.allclose(out2.astype(jnp.float32), ref2, atol=2e-2, rtol=2e-2), \
        "bf16 (resident-W path) mismatch vs reference"

    # --- Test 3: force the tiled non-resident path (tiny VMEM budget) so the
    #     K-rotation residual reuse is exercised with Kt = Nt = 3 and a
    #     partial last row tile. ------------------------------------------------
    out3 = jax.block_until_ready(
        residual_forward(x2, w2, b2, tm=256, resident_budget_bytes=512 * 1024))
    assert jnp.allclose(out3.astype(jnp.float32), ref2, atol=2e-2, rtol=2e-2), \
        "bf16 (tiled K-rotation path) mismatch vs reference"

    print("KERNEL_OK")
</pallas_src>

<mosaic_0001>
module attributes {stable_mosaic.version = 11 : i64} {
  func.func @residual_linear_kernel(%arg0: i32, %arg1: i32, %arg2: i32, %arg3: memref<8x128xf32, #tpu.memory_space<vmem>>, %arg4: memref<128x128xf32, #tpu.memory_space<vmem>>, %arg5: memref<1x128xf32, #tpu.memory_space<vmem>>, %arg6: memref<8x128xf32, #tpu.memory_space<vmem>>, %arg7: memref<8x128xf32, #tpu.memory_space<vmem>>) attributes {dimension_semantics = [#tpu.dimension_semantics<parallel>, #tpu.dimension_semantics<parallel>, #tpu.dimension_semantics<arbitrary>], iteration_bounds = array<i64: 2, 1, 1>, scalar_prefetch = 0 : i64, scratch_operands = 1 : i64, tpu.core_type = #tpu.core_type<tc>, window_params = [{transform_indices = @transform_0, window_bounds = array<i64: 8, 128>}, {transform_indices = @transform_1, window_bounds = array<i64: 128, 128>}, {transform_indices = @transform_2, window_bounds = array<i64: 1, 128>}, {transform_indices = @transform_3, window_bounds = array<i64: 8, 128>}]} {
    %c0_i32 = arith.constant 0 : i32
    %0 = arith.cmpi eq, %arg2, %c0_i32 : i32
    %1 = arith.extui %0 : i1 to i32
    %c0_i32_0 = arith.constant 0 : i32
    %2 = arith.cmpi ne, %1, %c0_i32_0 : i32
    scf.if %2 {
      %c0_10 = arith.constant 0 : index
      %c0_11 = arith.constant 0 : index
      %12 = vector.load %arg5[%c0_10, %c0_11] : memref<1x128xf32, #tpu.memory_space<vmem>>, vector<1x128xf32>
      %13 = vector.shape_cast %12 : vector<1x128xf32> to vector<1x128xf32>
      %14 = vector.broadcast %13 : vector<1x128xf32> to vector<8x128xf32>
      %c0_12 = arith.constant 0 : index
      %c0_13 = arith.constant 0 : index
      %15 = vector.load %arg7[%c0_12, %c0_13] : memref<8x128xf32, #tpu.memory_space<vmem>>, vector<8x128xf32>
      tpu.vector_store %arg7[%c0_12, %c0_13], %14 {strides = array<i32>} : memref<8x128xf32, #tpu.memory_space<vmem>>, vector<8x128xf32>,
    } else {
    }
    %c0 = arith.constant 0 : index
    %c0_1 = arith.constant 0 : index
    %3 = vector.load %arg7[%c0, %c0_1] : memref<8x128xf32, #tpu.memory_space<vmem>>, vector<8x128xf32>
    %c0_2 = arith.constant 0 : index
    %c0_3 = arith.constant 0 : index
    %4 = vector.load %arg3[%c0_2, %c0_3] : memref<8x128xf32, #tpu.memory_space<vmem>>, vector<8x128xf32>
    %c0_4 = arith.constant 0 : index
    %c0_5 = arith.constant 0 : index
    %5 = vector.load %arg4[%c0_4, %c0_5] : memref<128x128xf32, #tpu.memory_space<vmem>>, vector<128x128xf32>
    %cst = arith.constant dense<0.000000e+00> : vector<8x128xf32>
    %6 = tpu.matmul %4, %5, %cst {dimension_numbers = #tpu.dot_dimension_numbers<[1], [0], [0], [1], [0, 0, 1, 1], [], []>} : vector<8x128xf32>, vector<128x128xf32>, vector<8x128xf32> -> vector<8x128xf32>
    %7 = arith.addf %3, %6 : vector<8x128xf32>
    %c0_6 = arith.constant 0 : index
    %c0_7 = arith.constant 0 : index
    %8 = vector.load %arg7[%c0_6, %c0_7] : memref<8x128xf32, #tpu.memory_space<vmem>>, vector<8x128xf32>
    tpu.vector_store %arg7[%c0_6, %c0_7], %7 {strides = array<i32>} : memref<8x128xf32, #tpu.memory_space<vmem>>, vector<8x128xf32>,
    %c0_i32_8 = arith.constant 0 : i32
    %9 = arith.cmpi eq, %arg2, %c0_i32_8 : i32
    %10 = arith.extui %9 : i1 to i32
    %c0_i32_9 = arith.constant 0 : i32
    %11 = arith.cmpi ne, %10, %c0_i32_9 : i32
    scf.if %11 {
      %c0_10 = arith.constant 0 : index
      %c0_11 = arith.constant 0 : index
      %12 = vector.load %arg7[%c0_10, %c0_11] : memref<8x128xf32, #tpu.memory_space<vmem>>, vector<8x128xf32>
      %c0_12 = arith.constant 0 : index
      %c0_13 = arith.constant 0 : index
      %13 = vector.load %arg3[%c0_12, %c0_13] : memref<8x128xf32, #tpu.memory_space<vmem>>, vector<8x128xf32>
      %14 = arith.addf %12, %13 : vector<8x128xf32>
      %c0_14 = arith.constant 0 : index
      %c0_15 = arith.constant 0 : index
      %15 = vector.load %arg6[%c0_14, %c0_15] : memref<8x128xf32, #tpu.memory_space<vmem>>, vector<8x128xf32>
      tpu.vector_store %arg6[%c0_14, %c0_15], %14 {strides = array<i32>} : memref<8x128xf32, #tpu.memory_space<vmem>>, vector<8x128xf32>,
    } else {
    }
    return
  }
  func.func @transform_0(%arg0: i32, %arg1: i32, %arg2: i32) -> (i32, i32) {
    %0 = arith.addi %arg1, %arg2 : i32
    %c1_i32 = arith.constant 1 : i32
    %1 = arith.addi %0, %c1_i32 : i32
    %c1_i32_0 = arith.constant 1 : i32
    %c0_i32 = arith.constant 0 : i32
    %2 = arith.cmpi eq, %c1_i32_0, %c0_i32 : i32
    %c1_i32_1 = arith.constant 1 : i32
    %3 = arith.select %2, %c1_i32_1, %c1_i32_0 : i32
    %4 = arith.remsi %1, %3 : i32
    %c0_i32_2 = arith.constant 0 : i32
    %5 = arith.cmpi ne, %4, %c0_i32_2 : i32
    %c0_i32_3 = arith.constant 0 : i32
    %6 = arith.cmpi slt, %4, %c0_i32_3 : i32
    %c0_i32_4 = arith.constant 0 : i32
    %7 = arith.cmpi slt, %3, %c0_i32_4 : i32
    %8 = arith.xori %6, %7 : i1
    %9 = arith.andi %8, %5 : i1
    %10 = arith.addi %4, %3 : i32
    %11 = arith.select %9, %10, %4 : i32
    %c0_i32_5 = arith.constant 0 : i32
    return %arg0, %11 : i32, i32
  }
  func.func @transform_1(%arg0: i32, %arg1: i32, %arg2: i32) -> (i32, i32) {
    %0 = arith.addi %arg1, %arg2 : i32
    %c1_i32 = arith.constant 1 : i32
    %1 = arith.addi %0, %c1_i32 : i32
    %c1_i32_0 = arith.constant 1 : i32
    %c0_i32 = arith.constant 0 : i32
    %2 = arith.cmpi eq, %c1_i32_0, %c0_i32 : i32
    %c1_i32_1 = arith.constant 1 : i32
    %3 = arith.select %2, %c1_i32_1, %c1_i32_0 : i32
    %4 = arith.remsi %1, %3 : i32
    %c0_i32_2 = arith.constant 0 : i32
    %5 = arith.cmpi ne, %4, %c0_i32_2 : i32
    %c0_i32_3 = arith.constant 0 : i32
    %6 = arith.cmpi slt, %4, %c0_i32_3 : i32
    %c0_i32_4 = arith.constant 0 : i32
    %7 = arith.cmpi slt, %3, %c0_i32_4 : i32
    %8 = arith.xori %6, %7 : i1
    %9 = arith.andi %8, %5 : i1
    %10 = arith.addi %4, %3 : i32
    %11 = arith.select %9, %10, %4 : i32
    %c0_i32_5 = arith.constant 0 : i32
    return %11, %arg1 : i32, i32
  }
  func.func @transform_2(%arg0: i32, %arg1: i32, %arg2: i32) -> (i32, i32) {
    %c0_i32 = arith.constant 0 : i32
    %c0_i32_0 = arith.constant 0 : i32
    return %c0_i32, %arg1 : i32, i32
  }
  func.func @transform_3(%arg0: i32, %arg1: i32, %arg2: i32) -> (i32, i32) {
    %c0_i32 = arith.constant 0 : i32
    return %arg0, %arg1 : i32, i32
  }
}

</mosaic_0001>

<bundles_post_ra>
// kernel: residual_forward.1
= control target key start
LH: loop header
LB: loop body
LE: loop exit
PB: predicated region body
PF: predicated region fallthrough
CT: control target
= control target key end

     0   :  { %s462_s12 = smov 0   ;;  %s464_s13 = smov 0   ;;  %s550_s0 = inlined_call_operand.vmem [shape: f32[16,128], index: 0, kind: input, shape index: {}]   ;;  %s551_s1 = inlined_call_operand.vmem [shape: f32[128,128], index: 1, kind: input, shape index: {}]   ;;  %s552_s2 = inlined_call_operand.vmem [shape: f32[1,128], index: 2, kind: input, shape index: {}]   ;;  %s553_s3 = inlined_call_operand.vmem [shape: f32[16,128], index: 3, kind: output, shape index: {}]  }
   0x1   :  { %s466_s14 = smov 0  }
   0x2 LB: > { %s32_s15 = sadd.s32 1, %s436_s13  ;;  %p388_p0 = scmp.ge.s32.totalorder %s440_s14, 1  ;;  %s440_s14 = sphi %s466_s14, %s13_s14   ;;  %s436_s13 = sphi %s464_s13, %s555_s13   ;;  %s432_s12 = sphi %s462_s12, %s554_s12  }
   0x3   : > { %p34_p1 = scmp.ge.s32.totalorder %s32_s15, 2  ;;  %p174_p2 = scmp.lt.s32.totalorder %s440_s14, 3 }
   0x5   : > { %s557_s15 = smov (%p34_p1, %s32_s15), 0  ;;  %p175_p3 = pnand %p388_p0, %p174_p2 }
   0x6   : > { %p206_p4 = scmp.lt.s32.totalorder (!%p175_p3), %s432_s12, 1 }
   0x7   : > { %178 = sbr.rel (%p175_p3) target bundleno = 175 (0xaf), region = 32 }
   0xc   : > { %v250_v0 = vld [vmem:[%s551_s1 + $0x78] sm:$0xff]  ;;  %v249_v1 = vld [vmem:[%s551_s1 + $0x70] sm:$0xff]  ;;  %v248_v2 = vld [vmem:[%s551_s1 + $0x68] sm:$0xff]  ;;  %s559_s12 = smov (!%p206_p4, %s432_s12), 1 }
   0xd   : > { %251 = vmatpush.msra.mxu0 %v250_v0  ;;  %v247_v3 = vld [vmem:[%s551_s1 + $0x60] sm:$0xff]  ;;  %v246_v4 = vld [vmem:[%s551_s1 + $0x58] sm:$0xff]  ;;  %v245_v5 = vld [vmem:[%s551_s1 + $0x50] sm:$0xff]  ;;  %s389_s19 = sshll.u32 %s559_s12, 3 }
   0xe   : > { %v244_v6 = vld [vmem:[%s551_s1 + $0x48] sm:$0xff]  ;;  %v243_v7 = vld [vmem:[%s551_s1 + $0x40] sm:$0xff]  ;;  %v242_v8 = vld [vmem:[%s551_s1 + $0x38] sm:$0xff]  ;;  %s209_s26 = scalar_lea.vmem %s550_s0, %s389_s19  ;;  %s223_s5 = scalar_lea.vmem %s553_s3, %s389_s19 }
   0xf   : > { %252 = vmatpush.msra.mxu0 %v249_v1  ;;  %v241_v9 = vld [vmem:[%s551_s1 + $0x30] sm:$0xff]  ;;  %v240_v10 = vld [vmem:[%s551_s1 + $0x28] sm:$0xff]  ;;  %v239_v11 = vld [vmem:[%s551_s1 + $0x20] sm:$0xff] }
  0x10   : > { %v238_v12 = vld [vmem:[%s551_s1 + $0x18] sm:$0xff]  ;;  %v237_v13 = vld [vmem:[%s551_s1 + $0x10] sm:$0xff]  ;;  %v236_v14 = vld [vmem:[%s551_s1 + $0x8] sm:$0xff] }
  0x11   : > { %253 = vmatpush.msra.mxu0 %v248_v2  ;;  %v235_v15 = vld [vmem:[%s551_s1] sm:$0xff] }
  0x12   : > { %v234_v16 = vld [vmem:[%s209_s26] sm:$0xff] }
  0x13   : > { %254 = vmatpush.msra.mxu0 %v247_v3  ;;  %v417_v17 = vld [vmem:[%s552_s2] ss:$0 sm:$0xff] }
  0x15   : > { %255 = vmatpush.msra.mxu0 %v246_v4 }
  0x17   : > { %256 = vmatpush.msra.mxu0 %v245_v5 }
  0x19   : > { %257 = vmatpush.msra.mxu0 %v244_v6 }
  0x1b   : > { %258 = vmatpush.msra.mxu0 %v243_v7 }
  0x1d   : > { %259 = vmatpush.msra.mxu0 %v242_v8 }
  0x1f   : > { %260 = vmatpush.msra.mxu0 %v241_v9 }
  0x21   : > { %261 = vmatpush.msra.mxu0 %v240_v10 }
  0x23   : > { %262 = vmatpush.msra.mxu0 %v239_v11 }
  0x25   : > { %263 = vmatpush.msra.mxu0 %v238_v12 }
  0x27   : > { %264 = vmatpush.msra.mxu0 %v237_v13 }
  0x29   : > { %265 = vmatpush.msra.mxu0 %v236_v14 }
  0x2b   : > { %266 = vmatpush.msra.mxu0 %v235_v15 }
  0x2c   : > { %267 = vmatmul.f32.vlgmr.msra.gmra.mxu0 %v234_v16 }
  0xa9   : > { %v268_v18 = vpop.f32.mrf.mxu0 }
  0xaa   : > { %v271_v19 = vadd.f32 %v417_v17, %v268_v18 }
  0xac   : > { %v278_v20 = vadd.f32 %v271_v19, %v234_v16 }
  0xae   : > { %279 = vst [vmem:[%s223_s5] sm:$0xff] %v278_v20 }
  0xaf PF: > { %s13_s14 = sadd.s32 1, %s440_s14   ;;  %s554_s12 = smov %s436_s13 }
  0xb0   : > { %p10_p5 = scmp.ge.s32.totalorder %s13_s14, 4   ;;  %s555_s13 = smov %s557_s15 }
  0xb2   :  { %12 = sbr.rel (!%p10_p5) target bundleno = 2 (0x2), region = 76 }

</bundles_post_ra>
